<compile_context>
chip_gen: v6e
topology: v6e:2x2x1
jax: 0.10.0
libtpu: 0.0.40
codegen_flags: <defaults>
</compile_context>

<pallas_src>
import jax
import jax.numpy as jnp
from jax.experimental import pallas as pl
from jax.experimental.pallas import tpu as pltpu

LANES = 128


def _round_up(n, m):
    return ((n + m - 1) // m) * m


def mlp_kernel(x_ref, w1_ref, b1_ref, w2_ref, b2_ref, w3_ref, b3_ref, o_ref):
    # hidden1: relu(x @ w1 + b1)   — bf16 MXU operands, f32 accumulate, f32 epilogue
    x = x_ref[...].astype(jnp.bfloat16)
    h1 = jnp.dot(x, w1_ref[...], preferred_element_type=jnp.float32)
    h1 = jnp.maximum(h1 + b1_ref[...], 0.0)
    # hidden2: relu(h1 @ w2 + b2)
    h2 = jnp.dot(h1.astype(jnp.bfloat16), w2_ref[...],
                 preferred_element_type=jnp.float32)
    h2 = jnp.maximum(h2 + b2_ref[...], 0.0)
    # predict: h2 @ w3 + b3 (no activation); w3/b3 are lane-padded to 128
    out = jnp.dot(h2.astype(jnp.bfloat16), w3_ref[...],
                  preferred_element_type=jnp.float32)
    o_ref[...] = (out + b3_ref[...]).astype(o_ref.dtype)


def mlp_forward(x, w1, b1, w2, b2, w3, b3, *, block_batch=256):
    batch, n_feature = x.shape
    n_out = w3.shape[1]

    # Cast matmul operands to bf16 once (halves weight DMA bytes; MXU-native on all chips).
    w1b = w1.astype(jnp.bfloat16)
    w2b = w2.astype(jnp.bfloat16)

    # Pad the final projection to a lane-dense (…,128) output so the store is unmasked.
    n_out_p = _round_up(max(n_out, LANES), LANES)
    w3b = jnp.pad(w3, ((0, 0), (0, n_out_p - n_out))).astype(jnp.bfloat16)
    b3p = jnp.pad(b3, ((0, 0), (0, n_out_p - n_out)))

    # Tile only over batch; weights stay resident across the grid.
    tb = min(block_batch, _round_up(batch, 8))
    batch_p = _round_up(batch, tb)
    xp = jnp.pad(x, ((0, batch_p - batch), (0, 0))) if batch_p != batch else x
    grid = (batch_p // tb,)

    out = pl.pallas_call(
        mlp_kernel,
        out_shape=jax.ShapeDtypeStruct((batch_p, n_out_p), jnp.float32),
        grid=grid,
        in_specs=[
            pl.BlockSpec((tb, n_feature), lambda i: (i, 0)),   # x: blocked over batch
            pl.BlockSpec(w1b.shape, lambda i: (0, 0)),          # weights/biases: resident
            pl.BlockSpec(b1.shape, lambda i: (0, 0)),
            pl.BlockSpec(w2b.shape, lambda i: (0, 0)),
            pl.BlockSpec(b2.shape, lambda i: (0, 0)),
            pl.BlockSpec(w3b.shape, lambda i: (0, 0)),
            pl.BlockSpec(b3p.shape, lambda i: (0, 0)),
        ],
        out_specs=pl.BlockSpec((tb, n_out_p), lambda i: (i, 0)),
        compiler_params=pltpu.CompilerParams(
            dimension_semantics=("parallel",)),   # megacore-shardable on v7x
    )(xp, w1b, b1, w2b, b2, w3b, b3p)

    # Un-pad outside the kernel (cheap XLA slice).
    return out[:batch, :n_out]


def init_linear(key, n_in, n_out):
    # Deterministic init mimicking PyTorch Linear's uniform(-1/sqrt(in), 1/sqrt(in)).
    kw, kb = jax.random.split(key)
    bound = 1.0 / jnp.sqrt(jnp.float32(n_in))
    # Stored as (in, out) — transposed relative to PyTorch's (out, in).
    w = jax.random.uniform(kw, (n_in, n_out), jnp.float32, -bound, bound)
    b = jax.random.uniform(kb, (1, n_out), jnp.float32, -bound, bound)
    return w, b


if __name__ == "__main__":
    n_feature, n_hidden1, n_hidden2, n_output = 16, 32, 32, 8
    batch = 256          # two 128-row batch tiles -> grid=(2,), exercises the pipeline
    block_batch = 128

    key = jax.random.PRNGKey(0)
    kx, k1, k2, k3 = jax.random.split(key, 4)

    x = jax.random.normal(kx, (batch, n_feature), jnp.float32)
    w1, b1 = init_linear(k1, n_feature, n_hidden1)
    w2, b2 = init_linear(k2, n_hidden1, n_hidden2)
    w3, b3 = init_linear(k3, n_hidden2, n_output)

    out = mlp_forward(x, w1, b1, w2, b2, w3, b3, block_batch=block_batch)
    jax.block_until_ready(out)
    assert out.shape == (batch, n_output)

    # Reference 1: identical mixed-precision math (bf16 matmuls, f32 accumulate/epilogue).
    xb = x.astype(jnp.bfloat16)
    w1b, w2b, w3b = (w.astype(jnp.bfloat16) for w in (w1, w2, w3))
    r1 = jnp.maximum(jnp.dot(xb, w1b, preferred_element_type=jnp.float32) + b1, 0.0)
    r2 = jnp.maximum(jnp.dot(r1.astype(jnp.bfloat16), w2b,
                             preferred_element_type=jnp.float32) + b2, 0.0)
    ref_bf16 = jnp.dot(r2.astype(jnp.bfloat16), w3b,
                       preferred_element_type=jnp.float32) + b3
    assert jnp.allclose(out, ref_bf16, atol=1e-4, rtol=1e-4)

    # Reference 2: full-f32 PyTorch math, loose tolerance (bf16 operand rounding).
    ref_f32 = jnp.maximum(x @ w1 + b1, 0.0)
    ref_f32 = jnp.maximum(ref_f32 @ w2 + b2, 0.0)
    ref_f32 = ref_f32 @ w3 + b3
    assert jnp.allclose(out, ref_f32, atol=5e-2, rtol=5e-2)

    print("KERNEL_OK")
</pallas_src>

<mosaic_0001>
module attributes {stable_mosaic.version = 11 : i64} {
  func.func @mlp_kernel(%arg0: i32, %arg1: memref<128x16xf32, #tpu.memory_space<vmem>>, %arg2: memref<16x32xbf16, #tpu.memory_space<vmem>>, %arg3: memref<1x32xf32, #tpu.memory_space<vmem>>, %arg4: memref<32x32xbf16, #tpu.memory_space<vmem>>, %arg5: memref<1x32xf32, #tpu.memory_space<vmem>>, %arg6: memref<32x128xbf16, #tpu.memory_space<vmem>>, %arg7: memref<1x128xf32, #tpu.memory_space<vmem>>, %arg8: memref<128x128xf32, #tpu.memory_space<vmem>>) attributes {dimension_semantics = [#tpu.dimension_semantics<parallel>], iteration_bounds = array<i64: 2>, scalar_prefetch = 0 : i64, scratch_operands = 0 : i64, tpu.core_type = #tpu.core_type<tc>, window_params = [{transform_indices = @transform_0, window_bounds = array<i64: 128, 16>}, {pipeline_mode = #tpu.pipeline_mode<synchronous>, transform_indices = @transform_1, window_bounds = array<i64: 16, 32>}, {pipeline_mode = #tpu.pipeline_mode<synchronous>, transform_indices = @transform_2, window_bounds = array<i64: 1, 32>}, {pipeline_mode = #tpu.pipeline_mode<synchronous>, transform_indices = @transform_3, window_bounds = array<i64: 32, 32>}, {pipeline_mode = #tpu.pipeline_mode<synchronous>, transform_indices = @transform_4, window_bounds = array<i64: 1, 32>}, {pipeline_mode = #tpu.pipeline_mode<synchronous>, transform_indices = @transform_5, window_bounds = array<i64: 32, 128>}, {pipeline_mode = #tpu.pipeline_mode<synchronous>, transform_indices = @transform_6, window_bounds = array<i64: 1, 128>}, {transform_indices = @transform_7, window_bounds = array<i64: 128, 128>}]} {
    %c0 = arith.constant 0 : index
    %c0_0 = arith.constant 0 : index
    %0 = vector.load %arg1[%c0, %c0_0] : memref<128x16xf32, #tpu.memory_space<vmem>>, vector<128x16xf32>
    %1 = arith.truncf %0 : vector<128x16xf32> to vector<128x16xbf16>
    %c0_1 = arith.constant 0 : index
    %c0_2 = arith.constant 0 : index
    %2 = vector.load %arg2[%c0_1, %c0_2] : memref<16x32xbf16, #tpu.memory_space<vmem>>, vector<16x32xbf16>
    %cst = arith.constant dense<0.000000e+00> : vector<128x32xf32>
    %3 = tpu.matmul %1, %2, %cst {dimension_numbers = #tpu.dot_dimension_numbers<[1], [0], [0], [1], [0, 0, 1, 1], [], []>} : vector<128x16xbf16>, vector<16x32xbf16>, vector<128x32xf32> -> vector<128x32xf32>
    %c0_3 = arith.constant 0 : index
    %c0_4 = arith.constant 0 : index
    %4 = vector.load %arg3[%c0_3, %c0_4] : memref<1x32xf32, #tpu.memory_space<vmem>>, vector<1x32xf32>
    %5 = vector.broadcast %4 : vector<1x32xf32> to vector<128x32xf32>
    %6 = arith.addf %3, %5 : vector<128x32xf32>
    %cst_5 = arith.constant 0.000000e+00 : f32
    %7 = vector.broadcast %cst_5 : f32 to vector<128x32xf32>
    %8 = arith.maximumf %6, %7 : vector<128x32xf32>
    %9 = arith.truncf %8 : vector<128x32xf32> to vector<128x32xbf16>
    %c0_6 = arith.constant 0 : index
    %c0_7 = arith.constant 0 : index
    %10 = vector.load %arg4[%c0_6, %c0_7] : memref<32x32xbf16, #tpu.memory_space<vmem>>, vector<32x32xbf16>
    %cst_8 = arith.constant dense<0.000000e+00> : vector<128x32xf32>
    %11 = tpu.matmul %9, %10, %cst_8 {dimension_numbers = #tpu.dot_dimension_numbers<[1], [0], [0], [1], [0, 0, 1, 1], [], []>} : vector<128x32xbf16>, vector<32x32xbf16>, vector<128x32xf32> -> vector<128x32xf32>
    %c0_9 = arith.constant 0 : index
    %c0_10 = arith.constant 0 : index
    %12 = vector.load %arg5[%c0_9, %c0_10] : memref<1x32xf32, #tpu.memory_space<vmem>>, vector<1x32xf32>
    %13 = vector.broadcast %12 : vector<1x32xf32> to vector<128x32xf32>
    %14 = arith.addf %11, %13 : vector<128x32xf32>
    %cst_11 = arith.constant 0.000000e+00 : f32
    %15 = vector.broadcast %cst_11 : f32 to vector<128x32xf32>
    %16 = arith.maximumf %14, %15 : vector<128x32xf32>
    %17 = arith.truncf %16 : vector<128x32xf32> to vector<128x32xbf16>
    %c0_12 = arith.constant 0 : index
    %c0_13 = arith.constant 0 : index
    %18 = vector.load %arg6[%c0_12, %c0_13] : memref<32x128xbf16, #tpu.memory_space<vmem>>, vector<32x128xbf16>
    %cst_14 = arith.constant dense<0.000000e+00> : vector<128x128xf32>
    %19 = tpu.matmul %17, %18, %cst_14 {dimension_numbers = #tpu.dot_dimension_numbers<[1], [0], [0], [1], [0, 0, 1, 1], [], []>} : vector<128x32xbf16>, vector<32x128xbf16>, vector<128x128xf32> -> vector<128x128xf32>
    %c0_15 = arith.constant 0 : index
    %c0_16 = arith.constant 0 : index
    %20 = vector.load %arg7[%c0_15, %c0_16] : memref<1x128xf32, #tpu.memory_space<vmem>>, vector<1x128xf32>
    %21 = vector.broadcast %20 : vector<1x128xf32> to vector<128x128xf32>
    %22 = arith.addf %19, %21 : vector<128x128xf32>
    %c0_17 = arith.constant 0 : index
    %c0_18 = arith.constant 0 : index
    %23 = vector.load %arg8[%c0_17, %c0_18] : memref<128x128xf32, #tpu.memory_space<vmem>>, vector<128x128xf32>
    tpu.vector_store %arg8[%c0_17, %c0_18], %22 {strides = array<i32>} : memref<128x128xf32, #tpu.memory_space<vmem>>, vector<128x128xf32>,
    return
  }
  func.func @transform_0(%arg0: i32) -> (i32, i32) {
    %c0_i32 = arith.constant 0 : i32
    %c0_i32_0 = arith.constant 0 : i32
    return %arg0, %c0_i32 : i32, i32
  }
  func.func @transform_1(%arg0: i32) -> (i32, i32) {
    %c0_i32 = arith.constant 0 : i32
    %c0_i32_0 = arith.constant 0 : i32
    %c0_i32_1 = arith.constant 0 : i32
    return %c0_i32, %c0_i32_0 : i32, i32
  }
  func.func @transform_2(%arg0: i32) -> (i32, i32) {
    %c0_i32 = arith.constant 0 : i32
    %c0_i32_0 = arith.constant 0 : i32
    %c0_i32_1 = arith.constant 0 : i32
    return %c0_i32, %c0_i32_0 : i32, i32
  }
  func.func @transform_3(%arg0: i32) -> (i32, i32) {
    %c0_i32 = arith.constant 0 : i32
    %c0_i32_0 = arith.constant 0 : i32
    %c0_i32_1 = arith.constant 0 : i32
    return %c0_i32, %c0_i32_0 : i32, i32
  }
  func.func @transform_4(%arg0: i32) -> (i32, i32) {
    %c0_i32 = arith.constant 0 : i32
    %c0_i32_0 = arith.constant 0 : i32
    %c0_i32_1 = arith.constant 0 : i32
    return %c0_i32, %c0_i32_0 : i32, i32
  }
  func.func @transform_5(%arg0: i32) -> (i32, i32) {
    %c0_i32 = arith.constant 0 : i32
    %c0_i32_0 = arith.constant 0 : i32
    %c0_i32_1 = arith.constant 0 : i32
    return %c0_i32, %c0_i32_0 : i32, i32
  }
  func.func @transform_6(%arg0: i32) -> (i32, i32) {
    %c0_i32 = arith.constant 0 : i32
    %c0_i32_0 = arith.constant 0 : i32
    %c0_i32_1 = arith.constant 0 : i32
    return %c0_i32, %c0_i32_0 : i32, i32
  }
  func.func @transform_7(%arg0: i32) -> (i32, i32) {
    %c0_i32 = arith.constant 0 : i32
    %c0_i32_0 = arith.constant 0 : i32
    return %arg0, %c0_i32 : i32, i32
  }
}

</mosaic_0001>

<bundles_post_ra>
// kernel: tpu_custom_call.1
= control target key start
LH: loop header
LB: loop body
LE: loop exit
PB: predicated region body
PF: predicated region fallthrough
CT: control target
= control target key end

     0   :  { %12 = vsyncpa [#allocation3], 0  ;;  %s1328_s0 = inlined_call_operand.vmem [shape: f32[256,16], index: 0, kind: input, shape index: {}]   ;;  %s1329_s1 = inlined_call_operand.vmem [shape: bf16[16,32], index: 1, kind: input, shape index: {}]   ;;  %s1330_s2 = inlined_call_operand.vmem [shape: f32[1,32], index: 2, kind: input, shape index: {}]   ;;  %s1331_s3 = inlined_call_operand.vmem [shape: bf16[32,32], index: 3, kind: input, shape index: {}]   ;;  %s1332_s4 = inlined_call_operand.vmem [shape: f32[1,32], index: 4, kind: input, shape index: {}]   ;;  %s1333_s5 = inlined_call_operand.vmem [shape: bf16[32,128], index: 5, kind: input, shape index: {}]   ;;  %s1334_s6 = inlined_call_operand.vmem [shape: f32[1,128], index: 6, kind: input, shape index: {}]   ;;  %s1335_s7 = inlined_call_operand.hbm [shape: f32[256,128], index: 7, kind: output, shape index: {}]  }
   0x1   :  { %14 = vsyncpa [#allocation3 + $0x1], 0  ;;  %s1156_s24 = smov 0   ;;  %s1158_s25 = smov 0  }
   0x2   :  { %s1160_s26 = smov 0   ;;  %s1162_s27 = smov 0  }
   0x3 LB: > { %s1177_s28 = sadd.s32 4294967295, %s1111_s27   ;;  %s871_s29 = sadd.s32 4294967294, %s1111_s27   ;;  %s1111_s27 = sphi %s1162_s27, %s1341_s27   ;;  %s1107_s26 = sphi %s1160_s26, %s1340_s26   ;;  %s1103_s25 = sphi %s1158_s25, %s1339_s25   ;;  %s1099_s24 = sphi %s1156_s24, %s1338_s24  }
   0x4   : > { %s1181_s30 = sadd.s32 1, %s1111_s27   ;;  %s179_s8 = sadd.s32 1, %s1107_s26 }
   0x5   : > { %s176_s9 = ssub.s32 %s1111_s27, %s1181_s30  ;;  %p189_p0 = scmp.ne.s32.totalorder %s1107_s26, %s1103_s25 }
   0x6   : > { %p177_p1 = scmp.eq.s32.totalorder %s176_s9, 0  ;;  %p190_p2 = scmp.eq.s32.totalorder %s1177_s28, 1 }
   0x7   : > { %p195_p3 = scmp.ne.s32.totalorder %s1103_s25, %s1099_s24  ;;  %p196_p4 = scmp.eq.s32.totalorder %s871_s29, 1 }
   0x8   : > { %s1192_s10 = scalar_select %p177_p1, %s1107_s26, %s179_s8  }
   0x9   : > { %p1194_p5 = por %p190_p2, %p189_p0  ;;  %p1198_p6 = por %p196_p4, %p195_p3 }
   0xa   : > { %p874_p7 = scmp.ge.s32.totalorder %s1111_s27, 1  ;;  %p241_p8 = scmp.lt.s32.totalorder %s1111_s27, 3 }
   0xc   : > { %p242_p9 = pnand %p874_p7, %p241_p8 }
   0xd   : > { %s876_s15 = sshll.u32 (!%p242_p9), %s1177_s28, 4  ;;  %s915_s23 = sshll.u32 (!%p242_p9), %s1177_s28, 11 }
   0xe   : > { %245 = sbr.rel (%p242_p9) target bundleno = 677 (0x2a5), region = 48  ;;  %p274_p10 = scmp.lt.s32.totalorder (!%p242_p9), %s876_s15, 31 }
   0xf   : > { %s1280_s13 = scalar_lea.hbm (!%p242_p9), %s1335_s7, %s915_s23 }
  0x13   : > { %v1046_v0 = vld [vmem:[%s1329_s1] sm:$0xff]   ;;  %v1047_v1 = vld [vmem:[%s1331_s3 + $0x8] sm:$0xff]   ;;  %s1343_s15 = smov (!%p274_p10, %s876_s15), 31  ;;  %vm320_vm0 = vcmask 130048   ;;  %vm489_vm1 = vcmask 261120  }
  0x14   : > { %945 = vmatprep.subr.bf16.mxu0 %v1046_v0  ;;  %1003 = vmatprep.subr.bf16.mxu1 %v1046_v0  ;;  %s877_s18 = sshll.u32 %s1343_s15, 3  ;;  %v1048_v26 = vld [vmem:[%s1331_s3] sm:$0xff]   ;;  %v1049_v27 = vld [vmem:[%s1333_s5 + $0x8] sm:$0xff]   ;;  %s1113_s15 = smov [#allocation2]  }
  0x15   : > { %946 = vmatpush3.bf16.msra.mxu0 %v1046_v0  ;;  %1004 = vmatpush3.bf16.msra.mxu1 %v1046_v0  ;;  %s277_s21 = scalar_lea.vmem %s1328_s0, %s877_s18  ;;  %v878_v30 = vld [vmem:[%s1330_s2] ss:$0 sm:$0xff]  ;;  %s270_s18 = sand.u32 1, %s1103_s25  }
  0x16   : > { %963 = vmatprep.subr.bf16.mxu1 %v1047_v1  ;;  %v281_v2 = vld [vmem:[%s277_s21] sm:$0xff]  ;;  %v282_v3 = vld [vmem:[%s277_s21 + $0x8] sm:$0xff]  ;;  %v283_v4 = vld [vmem:[%s277_s21 + $0x10] sm:$0xff]  ;;  %983 = vmatprep.subr.bf16.mxu0 %v1049_v27  ;;  %s875_s19 = sshll.u32 %s270_s18, 7  ;;  %s1288_s28 = scalar_lea.sflag [#allocation3], %s270_s18 }
  0x17   : > { %v297_v5 = vpack.c.bf16 %v282_v3, %v281_v2  ;;  %v284_v6 = vld [vmem:[%s277_s21 + $0x18] sm:$0xff]  ;;  %v285_v7 = vld [vmem:[%s277_s21 + $0x20] sm:$0xff]  ;;  %v286_v8 = vld [vmem:[%s277_s21 + $0x28] sm:$0xff]  ;;  %s1259_s22 = scalar_lea.vmem [#allocation2], %s875_s19  ;;  %s1055_s16 = sshll.u32 %s1113_s15, 4  ;;  %s1056_s16 = int_to_ptr.vmem [resolvable:$false] %s1055_s16 }
  0x18   : > { %v298_v9 = vpack.c.bf16 %v284_v6, %v283_v4  ;;  %v299_v10 = vpack.c.bf16 %v286_v8, %v285_v7  ;;  %v289_v11 = vld [vmem:[%s277_s21 + $0x40] sm:$0xff]  ;;  %v290_v12 = vld [vmem:[%s277_s21 + $0x48] sm:$0xff]  ;;  %v291_v13 = vld [vmem:[%s277_s21 + $0x50] sm:$0xff]  ;;  %s809_s29 = sshll.u32 %s1259_s22, 4  ;;  %s1057_s17 = scalar_lea.vmem %s1056_s16, 4096  ;;  %s1282_s29 = int_to_ptr.vmem [resolvable:$true] %s809_s29 }
  0x19   : > { %947 = vmatprep.mubr.msk.bf16.mxu0 %vm320_vm0, %v297_v5  ;;  %v292_v14 = vld [vmem:[%s277_s21 + $0x58] sm:$0xff]  ;;  %v301_v15 = vpack.c.bf16 %v290_v12, %v289_v11  ;;  %v293_v17 = vld [vmem:[%s277_s21 + $0x60] sm:$0xff]  ;;  %v294_v18 = vld [vmem:[%s277_s21 + $0x68] sm:$0xff]  ;;  %s1051_s14 = scalar_lea.vmem %s1282_s29, 2048  ;;  %p1058_p0 = scmp.lt.s32.totalorder %s1282_s29, %s1056_s16 }
  0x1a   : > { %948 = vmatmul.mubr.msk.bf16.vlgmr.msra.gmra.mxu0 %vm320_vm0, %v298_v9  ;;  %v302_v16 = vpack.c.bf16 %v292_v14, %v291_v13  ;;  %v287_v19 = vld [vmem:[%s277_s21 + $0x30] sm:$0xff]  ;;  %v288_v20 = vld [vmem:[%s277_s21 + $0x38] sm:$0xff]  ;;  %v303_v21 = vpack.c.bf16 %v294_v18, %v293_v17  ;;  %p1052_p11 = scmp.ne.s32.totalorder %s1282_s29, %s1051_s14  ;;  %p1059_p1 = scmp.lt.s32.totalorder %s1057_s17, %s1051_s14 }
  0x1b   : > { %951 = vmatprep.mubr.msk.bf16.mxu0 %vm320_vm0, %v299_v10  ;;  %955 = vmatprep.mubr.msk.bf16.mxu1 %vm320_vm0, %v301_v15  ;;  %v300_v22 = vpack.c.bf16 %v288_v20, %v287_v19  ;;  %v295_v23 = vld [vmem:[%s277_s21 + $0x70] sm:$0xff]  ;;  %v296_v24 = vld [vmem:[%s277_s21 + $0x78] sm:$0xff] }
  0x1c   : > { %956 = vmatmul.mubr.msk.bf16.vlgmr.msra.gmra.mxu1 %vm320_vm0, %v302_v16  ;;  %v304_v25 = vpack.c.bf16 %v296_v24, %v295_v23  ;;  %984 = vmatpush3.bf16.msra.mxu0 %v1049_v27  ;;  %v888_v24 = vld [vmem:[%s1332_s4] ss:$0 sm:$0xff]  ;;  %p1053_p12 = pnand %p1052_p11, %p1194_p5  ;;  %p1060_p2 = por %p1059_p1, %p1058_p0 }
  0x1d   : > { %959 = vmatprep.mubr.msk.bf16.mxu1 %vm320_vm0, %v303_v21  ;;  %964 = vmatpush3.bf16.msra.mxu1 %v1047_v1  ;;  %v1050_v21 = vld [vmem:[%s1333_s5] sm:$0xff]  }
  0x1e   : > { %965 = vmatprep.subr.bf16.mxu1 %v1048_v26  ;;  %985 = vmatprep.subr.bf16.mxu0 %v1050_v21  ;;  %p1054_p13 = pneg %p1053_p12 }
  0x20   : > { %986 = vmatpush3.bf16.msra.mxu0 %v1050_v21  ;;  %p1061_p3 = pnand %p1060_p2, %p1054_p13 }
  0x21   : > { %966 = vmatpush3.bf16.msra.mxu1 %v1048_v26 }
  0x22   : > { %952 = vmatmul.mubr.msk.bf16.gmra.mxu0 %vm320_vm0, %v300_v22 }
  0x24   : > { %960 = vmatmul.mubr.msk.bf16.gmra.mxu1 %vm320_vm0, %v304_v25 }
  0xda   : > { %v949_v28 = vpop.f32.mrf.mxu0 }
  0xdb   : > { %v388_v36 = vadd.f32 %v949_v28, %v878_v30 }
  0xdc   : > { %v379_v29 = vpop.f32.mrf.mxu0  ;;  %v957_v31 = vpop.f32.mrf.mxu1 }
  0xdd   : > { %v380_v33 = vadd.f32 %v878_v30, %v379_v29  ;;  %v444_v45 = vmax.f32 %v388_v36, 0.0  ;;  %v420_v7 = vadd.f32 %v957_v31, %v878_v30 }
  0xde   : > { %v950_v32 = vpop.f32.mrf.mxu0  ;;  %v411_v35 = vpop.f32.mrf.mxu1 }
  0xdf   : > { %v391_v34 = vadd.f32 %v950_v32, %v878_v30  ;;  %v442_v42 = vmax.f32 %v380_v33, 0.0  ;;  %v412_v48 = vadd.f32 %v878_v30, %v411_v35  ;;  %v452_v12 = vmax.f32 %v420_v7, 0.0 }
  0xe0   : > { %v382_v37 = vpop.f32.mrf.mxu0  ;;  %v958_v39 = vpop.f32.mrf.mxu1 }
  0xe1   : > { %v383_v38 = vadd.f32 %v878_v30, %v382_v37  ;;  %v445_v40 = vmax.f32 %v391_v34, 0.0  ;;  %v450_v58 = vmax.f32 %v412_v48, 0.0  ;;  %v423_v9 = vadd.f32 %v958_v39, %v878_v30 }
  0xe2   : > { %v953_v41 = vpop.f32.mrf.mxu0  ;;  %v414_v44 = vpop.f32.mrf.mxu1 }
  0xe3   : > { %v443_v43 = vmax.f32 %v383_v38, 0.0  ;;  %v415_v49 = vadd.f32 %v878_v30, %v414_v44  ;;  %v459_v51 = vpack.c.bf16 %v445_v40, %v444_v45  ;;  %v404_v56 = vadd.f32 %v953_v41, %v878_v30 }
  0xe4   : > { %v395_v46 = vpop.f32.mrf.mxu0  ;;  %v961_v50 = vpop.f32.mrf.mxu1  ;;  %v453_v13 = vmax.f32 %v423_v9, 0.0 }
  0xe5   : > { %v458_v47 = vpack.c.bf16 %v443_v43, %v442_v42  ;;  %v396_v53 = vadd.f32 %v878_v30, %v395_v46  ;;  %v451_v60 = vmax.f32 %v415_v49, 0.0  ;;  %v448_v2 = vmax.f32 %v404_v56, 0.0 }
  0xe6   : > { %v954_v52 = vpop.f32.mrf.mxu0  ;;  %v427_v55 = vpop.f32.mrf.mxu1  ;;  %v463_v15 = vpack.c.bf16 %v453_v13, %v452_v12  ;;  %v436_v16 = vadd.f32 %v961_v50, %v878_v30 }
  0xe7   : > { %v407_v54 = vadd.f32 %v954_v52, %v878_v30  ;;  %967 = vmatprep.mubr.msk.bf16.mxu1 %vm489_vm1, %v458_v47  ;;  %v446_v63 = vmax.f32 %v396_v53, 0.0  ;;  %v462_v4 = vpack.c.bf16 %v451_v60, %v450_v58  ;;  %v428_v5 = vadd.f32 %v878_v30, %v427_v55 }
  0xe8   : > { %v398_v57 = vpop.f32.mrf.mxu0  ;;  %968 = vmatmul.mubr.msk.bf16.vlgmr.msra.gmra.mxu1 %vm489_vm1, %v459_v51  ;;  %v962_v61 = vpop.f32.mrf.mxu1  ;;  %v456_v18 = vmax.f32 %v436_v16, 0.0 }
  0xe9   : > { %v399_v59 = vadd.f32 %v878_v30, %v398_v57  ;;  %v449_v62 = vmax.f32 %v407_v54, 0.0  ;;  %v454_v10 = vmax.f32 %v428_v5, 0.0  ;;  %v439_v17 = vadd.f32 %v962_v61, %v878_v30 }
  0xea   : > { %v430_v1 = vpop.f32.mrf.mxu1 }
  0xeb   : > { %v447_v0 = vmax.f32 %v399_v59, 0.0  ;;  %v431_v6 = vadd.f32 %v878_v30, %v430_v1  ;;  %v461_v8 = vpack.c.bf16 %v449_v62, %v448_v2  ;;  %v457_v19 = vmax.f32 %v439_v17, 0.0 }
  0xed   : > { %v460_v3 = vpack.c.bf16 %v447_v0, %v446_v63  ;;  %v455_v11 = vmax.f32 %v431_v6, 0.0  ;;  %v465_v20 = vpack.c.bf16 %v457_v19, %v456_v18 }
  0xef   : > { %971 = vmatprep.mubr.msk.bf16.mxu1 %vm489_vm1, %v460_v3  ;;  %v464_v14 = vpack.c.bf16 %v455_v11, %v454_v10 }
  0xf0   : > { %972 = vmatmul.mubr.msk.bf16.gmra.mxu1 %vm489_vm1, %v461_v8 }
  0xf1   : > { %975 = vmatprep.mubr.msk.bf16.mxu1 %vm489_vm1, %v462_v4 }
  0xf8   : > { %976 = vmatmul.mubr.msk.bf16.gmra.mxu1 %vm489_vm1, %v463_v15  ;;  %v899_v15 = vld [vmem:[%s1334_s6] ss:$0 sm:$0xff] }
  0xf9   : > { %979 = vmatprep.mubr.msk.bf16.mxu1 %vm489_vm1, %v464_v14 }
 0x100   : > { %980 = vmatmul.mubr.msk.bf16.gmra.mxu1 %vm489_vm1, %v465_v20 }
 0x1a8   : > { %v969_v22 = vpop.f32.mrf.mxu1 }
 0x1a9   : > { %v557_v28 = vadd.f32 %v969_v22, %v888_v24 }
 0x1aa   : > { %v548_v23 = vpop.f32.mrf.mxu1 }
 0x1ab   : > { %v549_v26 = vadd.f32 %v888_v24, %v548_v23  ;;  %v613_v35 = vmax.f32 %v557_v28, 0.0 }
 0x1ac   : > { %v970_v25 = vpop.f32.mrf.mxu1 }
 0x1ad   : > { %v560_v27 = vadd.f32 %v970_v25, %v888_v24  ;;  %v611_v33 = vmax.f32 %v549_v26, 0.0 }
 0x1ae   : > { %v551_v29 = vpop.f32.mrf.mxu1 }
 0x1af   : > { %v552_v30 = vadd.f32 %v888_v24, %v551_v29  ;;  %v614_v31 = vmax.f32 %v560_v27, 0.0 }
 0x1b0   : > { %v973_v32 = vpop.f32.mrf.mxu1 }
 0x1b1   : > { %v612_v34 = vmax.f32 %v552_v30, 0.0  ;;  %v628_v38 = vpack.c.bf16 %v614_v31, %v613_v35  ;;  %v573_v42 = vadd.f32 %v973_v32, %v888_v24 }
 0x1b2   : > { %v564_v36 = vpop.f32.mrf.mxu1 }
 0x1b3   : > { %v627_v37 = vpack.c.bf16 %v612_v34, %v611_v33  ;;  %v565_v40 = vadd.f32 %v888_v24, %v564_v36  ;;  %v617_v49 = vmax.f32 %v573_v42, 0.0 }
 0x1b4   : > { %v974_v39 = vpop.f32.mrf.mxu1 }
 0x1b5   : > { %v576_v41 = vadd.f32 %v974_v39, %v888_v24  ;;  %987 = vmatprep.mubr.msk.bf16.mxu0 %vm489_vm1, %v627_v37  ;;  %v615_v47 = vmax.f32 %v565_v40, 0.0 }
 0x1b6   : > { %v567_v43 = vpop.f32.mrf.mxu1  ;;  %988 = vmatmul.mubr.msk.bf16.vlgmr.msra.gmra.mxu0 %vm489_vm1, %v628_v38 }
 0x1b7   : > { %v568_v44 = vadd.f32 %v888_v24, %v567_v43  ;;  %v618_v45 = vmax.f32 %v576_v41, 0.0 }
 0x1b8   : > { %v977_v46 = vpop.f32.mrf.mxu1 }
 0x1b9   : > { %v616_v48 = vmax.f32 %v568_v44, 0.0  ;;  %v630_v52 = vpack.c.bf16 %v618_v45, %v617_v49  ;;  %v589_v56 = vadd.f32 %v977_v46, %v888_v24 }
 0x1ba   : > { %v580_v50 = vpop.f32.mrf.mxu1 }
 0x1bb   : > { %v629_v51 = vpack.c.bf16 %v616_v48, %v615_v47  ;;  %v581_v54 = vadd.f32 %v888_v24, %v580_v50  ;;  %v621_v63 = vmax.f32 %v589_v56, 0.0 }
 0x1bc   : > { %v978_v53 = vpop.f32.mrf.mxu1 }
 0x1bd   : > { %v592_v55 = vadd.f32 %v978_v53, %v888_v24  ;;  %991 = vmatprep.mubr.msk.bf16.mxu0 %vm489_vm1, %v629_v51  ;;  %v619_v61 = vmax.f32 %v581_v54, 0.0 }
 0x1be   : > { %v583_v57 = vpop.f32.mrf.mxu1  ;;  %992 = vmatmul.mubr.msk.bf16.gmra.mxu0 %vm489_vm1, %v630_v52 }
 0x1bf   : > { %v584_v58 = vadd.f32 %v888_v24, %v583_v57  ;;  %v622_v59 = vmax.f32 %v592_v55, 0.0 }
 0x1c0   : > { %v981_v60 = vpop.f32.mrf.mxu1 }
 0x1c1   : > { %v620_v62 = vmax.f32 %v584_v58, 0.0  ;;  %v632_v2 = vpack.c.bf16 %v622_v59, %v621_v63  ;;  %v605_v6 = vadd.f32 %v981_v60, %v888_v24 }
 0x1c2   : > { %v596_v0 = vpop.f32.mrf.mxu1 }
 0x1c3   : > { %v631_v1 = vpack.c.bf16 %v620_v62, %v619_v61  ;;  %v597_v4 = vadd.f32 %v888_v24, %v596_v0  ;;  %v625_v12 = vmax.f32 %v605_v6, 0.0 }
 0x1c4   : > { %v982_v3 = vpop.f32.mrf.mxu1 }
 0x1c5   : > { %v608_v5 = vadd.f32 %v982_v3, %v888_v24  ;;  %995 = vmatprep.mubr.msk.bf16.mxu0 %vm489_vm1, %v631_v1  ;;  %v623_v10 = vmax.f32 %v597_v4, 0.0 }
 0x1c6   : > { %v599_v7 = vpop.f32.mrf.mxu1  ;;  %996 = vmatmul.mubr.msk.bf16.gmra.mxu0 %vm489_vm1, %v632_v2 }
 0x1c7   : > { %v600_v8 = vadd.f32 %v888_v24, %v599_v7  ;;  %v626_v9 = vmax.f32 %v608_v5, 0.0 }
 0x1c9   : > { %v624_v11 = vmax.f32 %v600_v8, 0.0  ;;  %v634_v14 = vpack.c.bf16 %v626_v9, %v625_v12 }
 0x1cb   : > { %v633_v13 = vpack.c.bf16 %v624_v11, %v623_v10 }
 0x1cd   : > { %999 = vmatprep.mubr.msk.bf16.mxu0 %vm489_vm1, %v633_v13 }
 0x1ce   : > { %1000 = vmatmul.mubr.msk.bf16.gmra.mxu0 %vm489_vm1, %v634_v14 }
 0x276   : > { %v989_v16 = vpop.f32.mrf.mxu0 }
 0x277   : > { %v725_v17 = vadd.f32 %v989_v16, %v899_v15 }
 0x278   : > { %v716_v18 = vpop.f32.mrf.mxu0 }
 0x279   : > { %781 = vst [vmem:[%s1259_s22 + $0x10] sm:$0xff] %v725_v17  ;;  %v717_v19 = vadd.f32 %v899_v15, %v716_v18 }
 0x27a   : > { %v990_v20 = vpop.f32.mrf.mxu0 }
 0x27b   : > { %779 = vst [vmem:[%s1259_s22] sm:$0xff] %v717_v19  ;;  %v728_v21 = vadd.f32 %v990_v20, %v899_v15 }
 0x27c   : > { %v719_v22 = vpop.f32.mrf.mxu0 }
 0x27d   : > { %782 = vst [vmem:[%s1259_s22 + $0x18] sm:$0xff] %v728_v21  ;;  %v720_v23 = vadd.f32 %v899_v15, %v719_v22 }
 0x27e   : > { %v993_v24 = vpop.f32.mrf.mxu0 }
 0x27f   : > { %780 = vst [vmem:[%s1259_s22 + $0x8] sm:$0xff] %v720_v23  ;;  %v741_v25 = vadd.f32 %v993_v24, %v899_v15 }
 0x280   : > { %v732_v26 = vpop.f32.mrf.mxu0 }
 0x281   : > { %785 = vst [vmem:[%s1259_s22 + $0x30] sm:$0xff] %v741_v25  ;;  %v733_v27 = vadd.f32 %v899_v15, %v732_v26 }
 0x282   : > { %v994_v28 = vpop.f32.mrf.mxu0 }
 0x283   : > { %783 = vst [vmem:[%s1259_s22 + $0x20] sm:$0xff] %v733_v27  ;;  %v744_v29 = vadd.f32 %v994_v28, %v899_v15 }
 0x284   : > { %v735_v30 = vpop.f32.mrf.mxu0 }
 0x285   : > { %786 = vst [vmem:[%s1259_s22 + $0x38] sm:$0xff] %v744_v29  ;;  %v736_v31 = vadd.f32 %v899_v15, %v735_v30 }
 0x286   : > { %v997_v32 = vpop.f32.mrf.mxu0 }
 0x287   : > { %784 = vst [vmem:[%s1259_s22 + $0x28] sm:$0xff] %v736_v31  ;;  %v757_v33 = vadd.f32 %v997_v32, %v899_v15 }
 0x288   : > { %v748_v34 = vpop.f32.mrf.mxu0 }
 0x289   : > { %789 = vst [vmem:[%s1259_s22 + $0x50] sm:$0xff] %v757_v33  ;;  %v749_v35 = vadd.f32 %v899_v15, %v748_v34 }
 0x28a   : > { %v998_v36 = vpop.f32.mrf.mxu0 }
 0x28b   : > { %787 = vst [vmem:[%s1259_s22 + $0x40] sm:$0xff] %v749_v35  ;;  %v760_v37 = vadd.f32 %v998_v36, %v899_v15 }
 0x28c   : > { %v751_v38 = vpop.f32.mrf.mxu0 }
 0x28d   : > { %790 = vst [vmem:[%s1259_s22 + $0x58] sm:$0xff] %v760_v37  ;;  %v752_v39 = vadd.f32 %v899_v15, %v751_v38 }
 0x28e   : > { %v1001_v40 = vpop.f32.mrf.mxu0 }
 0x28f   : > { %788 = vst [vmem:[%s1259_s22 + $0x48] sm:$0xff] %v752_v39  ;;  %v773_v41 = vadd.f32 %v1001_v40, %v899_v15 }
 0x290   : > { %v764_v42 = vpop.f32.mrf.mxu0 }
 0x291   : > { %793 = vst [vmem:[%s1259_s22 + $0x70] sm:$0xff] %v773_v41  ;;  %v765_v43 = vadd.f32 %v899_v15, %v764_v42 }
 0x292   : > { %v1002_v44 = vpop.f32.mrf.mxu0 }
 0x293   : > { %791 = vst [vmem:[%s1259_s22 + $0x60] sm:$0xff] %v765_v43  ;;  %v776_v45 = vadd.f32 %v1002_v44, %v899_v15 }
 0x294   : > { %v767_v46 = vpop.f32.mrf.mxu0 }
 0x295   : > { %794 = vst [vmem:[%s1259_s22 + $0x78] sm:$0xff] %v776_v45  ;;  %v768_v47 = vadd.f32 %v899_v15, %v767_v46 }
 0x297   : > { %792 = vst [vmem:[%s1259_s22 + $0x68] sm:$0xff] %v768_v47 }
 0x298   : > { %1064 = shalt.err (!%p1061_p3)
}
 0x299   : > { %s1065_s18 = scalar_lea.hbm %s1280_s13, 2048  ;;  %s1069_s21 = scalar_lea.hbm %s1335_s7, 4096 }
 0x29a   : > { %p1066_p4 = scmp.ne.s32.totalorder %s1280_s13, %s1065_s18  ;;  %p1070_p9 = scmp.lt.s32.totalorder %s1280_s13, %s1335_s7 }
 0x29b   : > { %p1071_p10 = scmp.lt.s32.totalorder %s1069_s21, %s1065_s18 }
 0x29c   : > { %p1067_p7 = pnand %p1066_p4, %p1194_p5 }
 0x29d   : > { %p1072_p11 = por %p1071_p10, %p1070_p9 }
 0x29e   : > { %p1068_p8 = pneg %p1067_p7 }
 0x2a0   : > { %p1073_p12 = pnand %p1072_p11, %p1068_p8 }
 0x2a2   : > { %1076 = shalt.err (!%p1073_p12)
}
 0x2a3   : > { %s1114_s8 = smov 128   ;;  %s1115_s9 = smov 8  }
 0x2a4   : > { %1005 = dma.vmem_to_hbm [thread:$0]  (%p1194_p5), %s1282_s29, 2048, %s1280_s13, %s1288_s28, %s1114_s8, %s1114_s8, %s1115_s9  }
 0x2a5 PF: > { %p1011_p13 = scmp.ge.s32.totalorder %s1111_s27, 2  ;;  %s824_s14 = sand.u32 1, %s1099_s24  }
 0x2a6   : > { %s825_s15 = scalar_lea.sflag [#allocation3], %s824_s14 }
 0x2a7   : > { %p1008_p0 = pnand %p1011_p13, %p1198_p6 }
 0x2a9   : > { %p1009_p1 = pneg %p1008_p0 }
 0x2ab   : > { %1094 = dma.done.wait (%p1009_p1), %s825_s15, 2048  }
 0x2ac   : > { %1096 = vsyncadd (%p1009_p1), %s825_s15, 4294965248  ;;  %p17_p2 = scmp.ge.s32.totalorder %s1181_s30, 4   ;;  %s1338_s24 = smov %s1103_s25 }
 0x2ad   : > { %s1339_s25 = smov %s1107_s26  ;;  %s1340_s26 = smov %s1192_s10 }
 0x2ae   : > { %s1341_s27 = smov %s1181_s30  ;;  %19 = sbr.rel (!%p17_p2) target bundleno = 3 (0x3), region = 83 }
 0x2b3   :  { %830 = vsyncpa [#allocation3], 1 }
 0x2b4   :  { %832 = vsyncpa [#allocation3 + $0x1], 1 }

</bundles_post_ra>
